<compile_context>
chip_gen: v5e
topology: v5e:2x2
jax: 0.10.0
libtpu: 0.0.40
codegen_flags: <defaults>
</compile_context>

<pallas_src>
import jax
import jax.numpy as jnp
from jax.experimental import pallas as pl
from jax.experimental.pallas import tpu as pltpu


def _cdiv(a, b):
    return (a + b - 1) // b


def _round_up(x, m):
    return _cdiv(x, m) * m


def _sublane_multiple(dtype):
    # Native sublane tile: 8 rows for 32-bit, 16 for 16-bit, 32 for 8-bit.
    return max(8, 32 // jnp.dtype(dtype).itemsize)


# ---------------------------------------------------------------------------
# Kernel 1: one-shot K/V projection (whole arrays resident in VMEM, runs once)
# ---------------------------------------------------------------------------
def _kv_proj_kernel(x2_ref, wk_ref, wv_ref, bk_ref, bv_ref, k_ref, v_ref):
    x2 = x2_ref[...]
    k_ref[...] = (jnp.dot(x2, wk_ref[...], preferred_element_type=jnp.float32)
                  + bk_ref[...]).astype(k_ref.dtype)
    v_ref[...] = (jnp.dot(x2, wv_ref[...], preferred_element_type=jnp.float32)
                  + bv_ref[...]).astype(v_ref.dtype)


# ---------------------------------------------------------------------------
# Kernel 2: streamed attention over query-row blocks
# ---------------------------------------------------------------------------
def _mhca_kernel(x1_ref, kt_ref, v_ref, wq_ref, wo_ref, bq_ref, bo_ref, o_ref):
    # Q projection; the 1/sqrt(8) scale is already folded into wq/bq.
    q1 = jnp.dot(x1_ref[...], wq_ref[...],
                 preferred_element_type=jnp.float32) + bq_ref[...]

    # Scores against the pre-transposed, resident K^T: [tb, N]. Plain jnp.dot,
    # no per-block transpose (K^T was produced once in the wrapper).
    s = jnp.dot(q1.astype(kt_ref.dtype), kt_ref[...],
                preferred_element_type=jnp.float32)

    # Numerically-stable softmax along the context axis.
    s = s - jnp.max(s, axis=-1, keepdims=True)
    p = jnp.exp(s)
    denom = jnp.sum(p, axis=-1, keepdims=True)
    r = pl.reciprocal(denom, approx=True)   # EUP vrcp (free slot)
    r = r * (2.0 - denom * r)               # one Newton step -> f32 accuracy
    p = p * r

    # attn @ V (operands in the activation dtype, f32 accumulation), then the
    # lane-dense (zero-padded) output projection.
    pv = jnp.dot(p.astype(v_ref.dtype), v_ref[...],
                 preferred_element_type=jnp.float32)
    out = jnp.dot(pv.astype(wo_ref.dtype), wo_ref[...],
                  preferred_element_type=jnp.float32) + bo_ref[...]
    o_ref[...] = out.astype(o_ref.dtype)


def _attention_call(x1_p, k_t, v2, wq_p, wo_p, bq_p, bo_p, *, tb,
                    vmem_limit, single_buffer_residents):
    b_pad, in_dim1 = x1_p.shape
    dq_pad, n_ctx = k_t.shape
    dv_pad = v2.shape[1]
    out_pad = wo_p.shape[1]
    nb = b_pad // tb

    if single_buffer_residents:
        def const_spec(shape):
            return pl.BlockSpec(shape, lambda i: (0, 0),
                                pipeline_mode=pl.Buffered(1))
    else:
        def const_spec(shape):
            return pl.BlockSpec(shape, lambda i: (0, 0))

    return pl.pallas_call(
        _mhca_kernel,
        out_shape=jax.ShapeDtypeStruct((b_pad, out_pad), x1_p.dtype),
        grid_spec=pltpu.PrefetchScalarGridSpec(
            num_scalar_prefetch=0,
            grid=(nb,),
            in_specs=[
                pl.BlockSpec((tb, in_dim1), lambda i: (i, 0)),   # x1 (streamed)
                const_spec((dq_pad, n_ctx)),                     # K^T (resident)
                const_spec((n_ctx, dv_pad)),                     # V   (resident)
                const_spec((in_dim1, dq_pad)),                   # Wq * scale
                const_spec((dv_pad, out_pad)),                   # Wo (padded)
                const_spec((1, dq_pad)),                         # bq * scale
                const_spec((1, out_pad)),                        # bo (padded)
            ],
            out_specs=pl.BlockSpec((tb, out_pad), lambda i: (i, 0)),
        ),
        compiler_params=pltpu.CompilerParams(
            dimension_semantics=("parallel",),
            vmem_limit_bytes=vmem_limit),
    )(x1_p, k_t, v2, wq_p, wo_p, bq_p, bo_p)


def mutilhead_cross_attention(x1, x2, params, *, block_b=256):
    """Fused cross-attention forward (K/V projection hoisted, queries streamed)."""
    B, in_dim1 = x1.shape
    N, in_dim2 = x2.shape
    wq, bq, wk, bk, wv, bv, wo, bo = params
    dq = wq.shape[1]
    dv = wv.shape[1]
    dtype = x1.dtype

    # ---- layout plumbing: zero-pad all projection widths to 128 lanes ------
    dq_pad = _round_up(dq, 128)
    dv_pad = _round_up(dv, 128)
    out_pad = _round_up(in_dim1, 128)
    scale = 1.0 / (8.0 ** 0.5)   # module hard-codes 8**0.5, NOT 1/sqrt(dq)

    wq_p = jnp.pad(wq, ((0, 0), (0, dq_pad - dq))) * scale   # fold scale once
    bq_p = jnp.pad(bq, ((0, 0), (0, dq_pad - dq))) * scale
    wk_p = jnp.pad(wk, ((0, 0), (0, dq_pad - dq)))
    bk_p = jnp.pad(bk, ((0, 0), (0, dq_pad - dq)))
    wv_p = jnp.pad(wv, ((0, 0), (0, dv_pad - dv)))
    bv_p = jnp.pad(bv, ((0, 0), (0, dv_pad - dv)))
    wo_p = jnp.pad(wo, ((0, dv_pad - dv), (0, out_pad - in_dim1)))
    bo_p = jnp.pad(bo, ((0, 0), (0, out_pad - in_dim1)))

    # ---- K/V projection: done ONCE, not once per query block ----------------
    k2, v2 = pl.pallas_call(
        _kv_proj_kernel,
        out_shape=(jax.ShapeDtypeStruct((N, dq_pad), x2.dtype),
                   jax.ShapeDtypeStruct((N, dv_pad), x2.dtype)),
    )(x2, wk_p, wv_p, bk_p, bv_p)
    k_t = k2.T        # one-off layout plumbing -> [dq_pad, N]

    # ---- query-row tiling ----------------------------------------------------
    sub = _sublane_multiple(dtype)
    # >= 2 blocks when B allows it (v7x shards the "parallel" axis over 2 TCs),
    # and tb sized to minimize padding of awkward B.
    nb = max(_cdiv(B, block_b), 2 if B > sub else 1)
    tb = _round_up(_cdiv(B, nb), sub)
    b_pad = _round_up(B, tb)
    x1_p = jnp.pad(x1, ((0, b_pad - B), (0, 0))) if b_pad != B else x1

    # ---- VMEM budget (scoped defaults: 16 MiB v5e / 32 MiB v6e,v7x) ---------
    itemsize = jnp.dtype(dtype).itemsize
    resident = (dq_pad * N + N * dv_pad + in_dim1 * dq_pad + dv_pad * out_pad
                + dq_pad + out_pad) * itemsize
    streamed = 2 * tb * (in_dim1 + out_pad) * itemsize        # x1/out, 2 buffers
    interm = tb * (2 * N + dq_pad + dv_pad + out_pad) * 4     # f32 temporaries
    vmem_limit = int(min(max(2 * (resident + streamed + interm), 32 << 20),
                         64 << 20))

    try:
        out = _attention_call(x1_p, k_t, v2, wq_p, wo_p, bq_p, bo_p,
                              tb=tb, vmem_limit=vmem_limit,
                              single_buffer_residents=True)
    except Exception:
        # pl.Buffered(1) on grid-invariant inputs not supported by this
        # JAX/Mosaic build: fall back to default double-buffering (identical
        # results, just 2x resident VMEM).
        out = _attention_call(x1_p, k_t, v2, wq_p, wo_p, bq_p, bo_p,
                              tb=tb, vmem_limit=vmem_limit,
                              single_buffer_residents=False)

    return out[:B, :in_dim1]


def init_params(key, in_dim1, in_dim2, k_dim, v_dim, num_heads, dtype=jnp.float32):
    """nn.Linear-like uniform init. Weights stored transposed [in, out]; biases [1, out]."""
    dq = k_dim * num_heads
    dv = v_dim * num_heads

    def linear(k, fan_in, fan_out):
        kw, kb = jax.random.split(k)
        bound = 1.0 / (fan_in ** 0.5)
        w = jax.random.uniform(kw, (fan_in, fan_out), dtype, -bound, bound)
        b = jax.random.uniform(kb, (1, fan_out), dtype, -bound, bound)
        return w, b

    kq, kk, kv, ko = jax.random.split(key, 4)
    wq, bq = linear(kq, in_dim1, dq)   # proj_q1
    wk, bk = linear(kk, in_dim2, dq)   # proj_k2
    wv, bv = linear(kv, in_dim2, dv)   # proj_v2
    wo, bo = linear(ko, dv, in_dim1)   # proj_o
    return (wq, bq, wk, bk, wv, bv, wo, bo)


def reference(x1, x2, params):
    wq, bq, wk, bk, wv, bv, wo, bo = params
    q1 = x1 @ wq + bq
    k2 = x2 @ wk + bk
    v2 = x2 @ wv + bv
    attn = jax.nn.softmax((q1 @ k2.T) / (8.0 ** 0.5), axis=-1)
    return (attn @ v2) @ wo + bo


if __name__ == "__main__":
    # Small shapes consistent with the module's 2-D forward (B=16 gives the
    # streamed grid two query blocks).
    B, N = 16, 8
    in_dim1, in_dim2 = 32, 16
    k_dim, v_dim, num_heads = 8, 8, 4

    key = jax.random.PRNGKey(0)
    kx1, kx2, kp = jax.random.split(key, 3)
    x1 = jax.random.normal(kx1, (B, in_dim1), jnp.float32)
    x2 = jax.random.normal(kx2, (N, in_dim2), jnp.float32)
    params = init_params(kp, in_dim1, in_dim2, k_dim, v_dim, num_heads)

    out = mutilhead_cross_attention(x1, x2, params)
    out = jax.block_until_ready(out)

    ref = reference(x1, x2, params)
    assert out.shape == (B, in_dim1)
    assert jnp.allclose(out, ref, atol=1e-4, rtol=1e-4), \
        float(jnp.max(jnp.abs(out - ref)))

    print("KERNEL_OK")
</pallas_src>

<mosaic_0001>
module attributes {stable_mosaic.version = 11 : i64} {
  func.func @_kv_proj_kernel(%arg0: memref<8x16xf32, #tpu.memory_space<vmem>>, %arg1: memref<16x128xf32, #tpu.memory_space<vmem>>, %arg2: memref<16x128xf32, #tpu.memory_space<vmem>>, %arg3: memref<1x128xf32, #tpu.memory_space<vmem>>, %arg4: memref<1x128xf32, #tpu.memory_space<vmem>>, %arg5: memref<8x128xf32, #tpu.memory_space<vmem>>, %arg6: memref<8x128xf32, #tpu.memory_space<vmem>>) attributes {dimension_semantics = [], scalar_prefetch = 0 : i64, scratch_operands = 0 : i64, tpu.core_type = #tpu.core_type<tc>} {
    %c0 = arith.constant 0 : index
    %c0_0 = arith.constant 0 : index
    %0 = vector.load %arg0[%c0, %c0_0] : memref<8x16xf32, #tpu.memory_space<vmem>>, vector<8x16xf32>
    %c0_1 = arith.constant 0 : index
    %c0_2 = arith.constant 0 : index
    %1 = vector.load %arg1[%c0_1, %c0_2] : memref<16x128xf32, #tpu.memory_space<vmem>>, vector<16x128xf32>
    %cst = arith.constant dense<0.000000e+00> : vector<8x128xf32>
    %2 = tpu.matmul %0, %1, %cst {dimension_numbers = #tpu.dot_dimension_numbers<[1], [0], [0], [1], [0, 0, 1, 1], [], []>} : vector<8x16xf32>, vector<16x128xf32>, vector<8x128xf32> -> vector<8x128xf32>
    %c0_3 = arith.constant 0 : index
    %c0_4 = arith.constant 0 : index
    %3 = vector.load %arg3[%c0_3, %c0_4] : memref<1x128xf32, #tpu.memory_space<vmem>>, vector<1x128xf32>
    %4 = vector.broadcast %3 : vector<1x128xf32> to vector<8x128xf32>
    %5 = arith.addf %2, %4 : vector<8x128xf32>
    %c0_5 = arith.constant 0 : index
    %c0_6 = arith.constant 0 : index
    %6 = vector.load %arg5[%c0_5, %c0_6] : memref<8x128xf32, #tpu.memory_space<vmem>>, vector<8x128xf32>
    tpu.vector_store %arg5[%c0_5, %c0_6], %5 {strides = array<i32>} : memref<8x128xf32, #tpu.memory_space<vmem>>, vector<8x128xf32>,
    %c0_7 = arith.constant 0 : index
    %c0_8 = arith.constant 0 : index
    %7 = vector.load %arg2[%c0_7, %c0_8] : memref<16x128xf32, #tpu.memory_space<vmem>>, vector<16x128xf32>
    %cst_9 = arith.constant dense<0.000000e+00> : vector<8x128xf32>
    %8 = tpu.matmul %0, %7, %cst_9 {dimension_numbers = #tpu.dot_dimension_numbers<[1], [0], [0], [1], [0, 0, 1, 1], [], []>} : vector<8x16xf32>, vector<16x128xf32>, vector<8x128xf32> -> vector<8x128xf32>
    %c0_10 = arith.constant 0 : index
    %c0_11 = arith.constant 0 : index
    %9 = vector.load %arg4[%c0_10, %c0_11] : memref<1x128xf32, #tpu.memory_space<vmem>>, vector<1x128xf32>
    %10 = vector.broadcast %9 : vector<1x128xf32> to vector<8x128xf32>
    %11 = arith.addf %8, %10 : vector<8x128xf32>
    %c0_12 = arith.constant 0 : index
    %c0_13 = arith.constant 0 : index
    %12 = vector.load %arg6[%c0_12, %c0_13] : memref<8x128xf32, #tpu.memory_space<vmem>>, vector<8x128xf32>
    tpu.vector_store %arg6[%c0_12, %c0_13], %11 {strides = array<i32>} : memref<8x128xf32, #tpu.memory_space<vmem>>, vector<8x128xf32>,
    return
  }
}

</mosaic_0001>

<bundles_post_ra>
// kernel: tpu_custom_call.1
= control target key start
LH: loop header
LB: loop body
LE: loop exit
PB: predicated region body
PF: predicated region fallthrough
CT: control target
= control target key end

     0   :  { %12 = vsyncpa [#allocation3], 0  ;;  %s364_s0 = inlined_call_operand.hbm [shape: f32[8,16], index: 0, kind: input, shape index: {}]   ;;  %s365_s1 = inlined_call_operand.hbm [shape: f32[16,128], index: 1, kind: input, shape index: {}]   ;;  %s366_s2 = inlined_call_operand.hbm [shape: f32[16,128], index: 2, kind: input, shape index: {}]   ;;  %s367_s3 = inlined_call_operand.vmem [shape: f32[1,128], index: 3, kind: input, shape index: {}]   ;;  %s368_s4 = inlined_call_operand.vmem [shape: f32[1,128], index: 4, kind: input, shape index: {}]   ;;  %s369_s5 = inlined_call_operand.hbm [shape: f32[8,128], index: 5, kind: output, shape index: {0}]   ;;  %s370_s6 = inlined_call_operand.hbm [shape: f32[8,128], index: 6, kind: output, shape index: {1}]  }
   0x1   :  { %13 = vsyncpa [#allocation6], 0 }
   0x2   :  { %14 = vsyncpa [#allocation4], 0  ;;  %s31_s23 = sshll.u32 %s365_s1, 4  ;;  %s32_s23 = int_to_ptr.hbm [resolvable:$true] %s31_s23 }
   0x3   :  { %15 = vsyncpa [#allocation10], 0  ;;  %s301_s24 = smov [#allocation5]   ;;  %s21_s28 = sshll.u32 %s364_s0, 4  ;;  %s22_s28 = int_to_ptr.hbm [resolvable:$true] %s21_s28 }
   0x4   :  { %s33_s25 = sshll.u32 %s301_s24, 4  ;;  %s302_s29 = smov 128   ;;  %s34_s25 = int_to_ptr.vmem [resolvable:$true] %s33_s25 }
   0x5   :  { %s303_s30 = smov 8   ;;  %s304_s7 = smov [#allocation2]  }
   0x6   :  { %39 = dma.hbm_to_vmem [thread:$0]  %s32_s23, 256, %s34_s25, [#allocation6], %s302_s29, %s302_s29, %s303_s30  }
   0x7   :  { %s23_s8 = sshll.u32 %s304_s7, 4  ;;  %s44_s11 = sshll.u32 %s366_s2, 4  ;;  %s24_s8 = int_to_ptr.vmem [resolvable:$true] %s23_s8  ;;  %s45_s11 = int_to_ptr.hbm [resolvable:$true] %s44_s11 }
   0x8   :  { %26 = dma.hbm_to_vmem [thread:$0]  %s22_s28, 128, %s24_s8, [#allocation3]  }
   0x9   :  { %s305_s1 = smov [#allocation7]  }
   0xa   :  { %s46_s12 = sshll.u32 %s305_s1, 4  ;;  %s47_s12 = int_to_ptr.vmem [resolvable:$true] %s46_s12 }
   0xb   :  { %52 = dma.hbm_to_vmem [thread:$0]  %s45_s11, 256, %s47_s12, [#allocation6], %s302_s29, %s302_s29, %s303_s30  }
   0xc   :  { %293 = dma.done.wait [#allocation3], 128  }
   0xd   :  { %294 = vsyncadd [#allocation3], 4294967168 }
   0xe   :  { %295 = dma.done.wait [#allocation6], 512  }
   0xf   :  { %296 = vsyncadd [#allocation6], 4294966784  ;;  %v71_v0 = vld [vmem:[#allocation5 + $0x8] sm:$0xff]  ;;  %v102_v1 = vld [vmem:[#allocation7 + $0x8] sm:$0xff]  ;;  %vm76_vm0 = vcmask 130048   ;;  %s306_s15 = smov [#allocation8]  }
  0x10   :  { %v70_v2 = vld [vmem:[#allocation5] sm:$0xff]  ;;  %94 = vmatpush.msra.mxu0 %v71_v0  ;;  %121 = vmatpush.msra.mxu1 %v102_v1  ;;  %v101_v3 = vld [vmem:[#allocation7] sm:$0xff]  ;;  %v69_v4 = vld [vmem:[#allocation2] sm:$0xff]  ;;  %s133_s16 = sshll.u32 %s306_s15, 4  ;;  %s135_s19 = sshll.u32 %s369_s5, 4  ;;  %s134_s16 = int_to_ptr.vmem [resolvable:$true] %s133_s16  ;;  %s136_s19 = int_to_ptr.hbm [resolvable:$true] %s135_s19 }
  0x11   :  { %v171_v5 = vld [vmem:[%s367_s3] ss:$0 sm:$0xff]  ;;  %s307_s20 = smov [#allocation9]   ;;  %s146_s24 = sshll.u32 %s370_s6, 4  ;;  %s147_s24 = int_to_ptr.hbm [resolvable:$true] %s146_s24 }
  0x12   :  { %95 = vmatpush.msra.mxu0 %v70_v2  ;;  %122 = vmatpush.msra.mxu1 %v101_v3  ;;  %v172_v6 = vld [vmem:[%s368_s4] ss:$0 sm:$0xff]  ;;  %s144_s21 = sshll.u32 %s307_s20, 4  ;;  %s145_s21 = int_to_ptr.vmem [resolvable:$true] %s144_s21 }
  0x13   :  { %162 = vmatmul.msk.f32.vlgmr.msra.gmra.mxu0 %vm76_vm0, %v69_v4  ;;  %163 = vmatmul.msk.f32.vlgmr.msra.gmra.mxu1 %vm76_vm0, %v69_v4 }
  0x90   :  { %v97_v7 = vpop.f32.mrf.mxu0  ;;  %v124_v8 = vpop.f32.mrf.mxu1 }
  0x91   :  { %v98_v9 = vadd.f32 %v171_v5, %v97_v7  ;;  %v125_v10 = vadd.f32 %v172_v6, %v124_v8 }
  0x93   :  { %100 = vst [vmem:[#allocation8] sm:$0xff] %v98_v9 }
  0x94   :  { %127 = vst [vmem:[#allocation9] sm:$0xff] %v125_v10  ;;  %138 = dma.vmem_to_hbm [thread:$0]  %s134_s16, 128, %s136_s19, [#allocation4]  }
  0x95   :  { %149 = dma.vmem_to_hbm [thread:$0]  %s145_s21, 128, %s147_s24, [#allocation10]  }
  0x96   :  { %297 = dma.done.wait [#allocation4], 128  }
  0x97   :  { %298 = vsyncadd [#allocation4], 4294967168 }
  0x98   :  { %299 = dma.done.wait [#allocation10], 128  }
  0x99   :  { %300 = vsyncadd [#allocation10], 4294967168 }
  0x9a   :  { %158 = vsyncpa [#allocation3], 1 }
  0x9b   :  { %159 = vsyncpa [#allocation6], 1 }
  0x9c   :  { %160 = vsyncpa [#allocation4], 1 }
  0x9d   :  { %161 = vsyncpa [#allocation10], 1 }

</bundles_post_ra>
